<compile_context>
chip_gen: v6e
topology: v6e:2x2x1
jax: 0.10.0
libtpu: 0.0.40
codegen_flags: <defaults>
</compile_context>

<pallas_src>
import math
import jax
import jax.numpy as jnp
from jax.experimental import pallas as pl
from jax.experimental.pallas import tpu as pltpu

# ---------------- problem sizes (small, consistent with the module) -------------
B = 2          # batch
S = 8          # sequence length
D_MODEL = 32   # d_model
N_HEADS = 4    # num_heads
D_K = D_MODEL // N_HEADS
D_FF = 64      # feed-forward hidden
LN_EPS = 1e-5

HD = N_HEADS * D_MODEL          # width of the head-packed (Wv @ Wo) block = 128

# Rows of the packed bias / LayerNorm vector slab (each row padded to D_FF lanes).
_ROW_BQ, _ROW_BK, _ROW_BATT, _ROW_G1, _ROW_BE1, _ROW_B1, _ROW_B2, _ROW_G2, _ROW_BE2 = range(9)


def _layernorm(x, gamma, beta):
    # x: (N, D); gamma/beta: (1, D). Biased variance, like torch.nn.LayerNorm.
    mean = jnp.mean(x, axis=-1, keepdims=True)
    var = jnp.mean((x - mean) ** 2, axis=-1, keepdims=True)
    inv = jax.lax.rsqrt(var + LN_EPS)
    return (x - mean) * inv * gamma + beta


def encoder_layer_kernel(
    x_ref,        # (B*S, D)
    wqkvo_ref,    # (D, HD + 2D) = [ Wv@Wo (head-packed, 128) | Wq*scale (32) | Wk (32) ]
    w1_ref,       # (D, D_FF)
    w2_ref,       # (D_FF, D)
    vec_ref,      # (9, D_FF)  packed bias / LayerNorm rows
    out_ref,      # (B*S, D)
):
    x = x_ref[...]                                                     # (B*S, D)
    V = vec_ref[...]                                                   # (9, D_FF)

    b_q   = V[_ROW_BQ:_ROW_BQ + 1, :D_MODEL]      # scale already folded in
    b_k   = V[_ROW_BK:_ROW_BK + 1, :D_MODEL]
    b_att = V[_ROW_BATT:_ROW_BATT + 1, :D_MODEL]  # = bv @ Wo + bo
    g1    = V[_ROW_G1:_ROW_G1 + 1, :D_MODEL]
    be1   = V[_ROW_BE1:_ROW_BE1 + 1, :D_MODEL]
    b1    = V[_ROW_B1:_ROW_B1 + 1, :D_FF]
    b2    = V[_ROW_B2:_ROW_B2 + 1, :D_MODEL]
    g2    = V[_ROW_G2:_ROW_G2 + 1, :D_MODEL]
    be2   = V[_ROW_BE2:_ROW_BE2 + 1, :D_MODEL]

    # ---- one fused projection: head-packed (V @ Wo), Q (pre-scaled), K ----------
    proj = jnp.dot(x, wqkvo_ref[...], preferred_element_type=jnp.float32)   # (B*S, 192)
    vo = proj[:, :HD].reshape(B, S, HD)                                     # (B, S, 128)
    q = (proj[:, HD:HD + D_MODEL] + b_q).reshape(B, S, D_MODEL)             # (B, S, 32)
    k = (proj[:, HD + D_MODEL:HD + 2 * D_MODEL] + b_k).reshape(B, S, D_MODEL)

    # ---- multi-head attention (Wo already folded into vo; heads merge by += ) ---
    attn = jnp.zeros((B, S, D_MODEL), jnp.float32)
    for h in range(N_HEADS):
        lo = h * D_K
        qh = q[:, :, lo:lo + D_K]                                           # (B, S, d_k)
        kh = k[:, :, lo:lo + D_K]
        s = jnp.einsum('bqd,bkd->bqk', qh, kh,
                       preferred_element_type=jnp.float32)                  # (B, S, S)
        s = s - jnp.max(s, axis=-1, keepdims=True)
        p = jnp.exp(s)
        p = p * pl.reciprocal(jnp.sum(p, axis=-1, keepdims=True), approx=False)
        voh = vo[:, :, h * D_MODEL:(h + 1) * D_MODEL]                       # (B, S, 32)
        attn = attn + jnp.einsum('bqk,bkd->bqd', p, voh,
                                 preferred_element_type=jnp.float32)        # (B, S, 32)

    attn = attn.reshape(B * S, D_MODEL) + b_att

    # ---- residual + LayerNorm1 (dropout = identity) ------------------------------
    x1 = _layernorm(x + attn, g1, be1)

    # ---- position-wise feed-forward ----------------------------------------------
    h1 = jnp.dot(x1, w1_ref[...], preferred_element_type=jnp.float32) + b1
    h1 = jnp.maximum(h1, 0.0)
    ff = jnp.dot(h1, w2_ref[...], preferred_element_type=jnp.float32) + b2

    # ---- residual + LayerNorm2 ----------------------------------------------------
    out_ref[...] = _layernorm(x1 + ff, g2, be2)


def pack_params(params):
    """Pack PyTorch-style params into the kernel operand layout. Done ONCE at init."""
    (wq, bq, wk, bk, wv, bv, wo, bo,
     g1, be1, w1, b1, w2, b2, g2, be2) = params
    scale = 1.0 / math.sqrt(D_K)

    # Fold Wo into the V path: W_vo_h = Wv_h @ Wo_h  (head-packed, lane-dense 128 cols).
    w_vo = jnp.concatenate(
        [wv[:, h * D_K:(h + 1) * D_K] @ wo[h * D_K:(h + 1) * D_K, :]
         for h in range(N_HEADS)], axis=1)                       # (D, H*D) = (32, 128)
    # Fold the attention scale into the Q projection (weight AND bias).
    wqkvo = jnp.concatenate([w_vo, wq * scale, wk], axis=1)      # (32, 192)
    b_att = bv @ wo + bo                                         # bias of folded V/O path

    def row(v):  # pad a 1-D vector to one (1, D_FF) slab row
        return jnp.pad(v, (0, D_FF - v.shape[0]))[None, :]

    vecs = jnp.concatenate(
        [row(bq * scale), row(bk), row(b_att), row(g1), row(be1),
         row(b1), row(b2), row(g2), row(be2)], axis=0)           # (9, 64)

    return (wqkvo, w1, w2, vecs)


@jax.jit
def encoder_layer(x, ops):
    wqkvo, w1, w2, vecs = ops
    x2 = x.reshape(B * S, D_MODEL)            # flatten batch for the MXU / stores

    vmem = pl.BlockSpec(memory_space=pltpu.MemorySpace.VMEM)
    out = pl.pallas_call(
        encoder_layer_kernel,
        out_shape=jax.ShapeDtypeStruct((B * S, D_MODEL), jnp.float32),
        in_specs=[vmem] * 5,                  # whole arrays resident in VMEM, no grid
        out_specs=vmem,
    )(x2, wqkvo, w1, w2, vecs)
    return out.reshape(B, S, D_MODEL)


def init_params(key):
    ks = jax.random.split(key, 8)

    def lin(k, fan_in, fan_out):
        # PyTorch nn.Linear weight is (out, in); we pre-transpose to (in, out).
        bound = 1.0 / math.sqrt(fan_in)
        w = jax.random.uniform(k, (fan_out, fan_in), jnp.float32, -bound, bound)
        b = jax.random.uniform(jax.random.fold_in(k, 1), (fan_out,), jnp.float32, -bound, bound)
        return w.T, b

    wq, bq = lin(ks[0], D_MODEL, D_MODEL)
    wk, bk = lin(ks[1], D_MODEL, D_MODEL)
    wv, bv = lin(ks[2], D_MODEL, D_MODEL)
    wo, bo = lin(ks[3], D_MODEL, D_MODEL)
    w1, b1 = lin(ks[4], D_MODEL, D_FF)
    w2, b2 = lin(ks[5], D_FF, D_MODEL)
    g1 = jnp.ones((D_MODEL,), jnp.float32)
    be1 = jnp.zeros((D_MODEL,), jnp.float32)
    g2 = jnp.ones((D_MODEL,), jnp.float32)
    be2 = jnp.zeros((D_MODEL,), jnp.float32)
    return (wq, bq, wk, bk, wv, bv, wo, bo, g1, be1, w1, b1, w2, b2, g2, be2)


def reference(x, params):
    # pure-JAX reference (matches the PyTorch module in eval mode)
    (wq, bq, wk, bk, wv, bv, wo, bo,
     g1, be1, w1, b1, w2, b2, g2, be2) = params

    def ln(y, g, b):
        m = jnp.mean(y, axis=-1, keepdims=True)
        v = jnp.mean((y - m) ** 2, axis=-1, keepdims=True)
        return (y - m) * jax.lax.rsqrt(v + LN_EPS) * g + b

    q = x @ wq + bq
    k = x @ wk + bk
    v = x @ wv + bv
    qh = q.reshape(B, S, N_HEADS, D_K).transpose(0, 2, 1, 3)
    kh = k.reshape(B, S, N_HEADS, D_K).transpose(0, 2, 1, 3)
    vh = v.reshape(B, S, N_HEADS, D_K).transpose(0, 2, 1, 3)
    scores = jnp.einsum("bhsd,bhtd->bhst", qh, kh) / math.sqrt(D_K)
    p = jax.nn.softmax(scores, axis=-1)
    o = jnp.einsum("bhst,bhtd->bhsd", p, vh).transpose(0, 2, 1, 3).reshape(B, S, D_MODEL)
    attn = o @ wo + bo
    x1 = ln(x + attn, g1, be1)
    ff = jnp.maximum(x1 @ w1 + b1, 0.0) @ w2 + b2
    return ln(x1 + ff, g2, be2)


if __name__ == "__main__":
    key = jax.random.PRNGKey(0)
    kx, kp = jax.random.split(key)
    x = jax.random.normal(kx, (B, S, D_MODEL), jnp.float32)
    params = init_params(kp)

    ops = pack_params(params)                 # one-time packing, outside the hot path
    out = encoder_layer(x, ops)               # jitted: reshape + pallas_call fused
    out = jax.block_until_ready(out)

    ref = reference(x, params)
    assert out.shape == (B, S, D_MODEL)
    assert jnp.allclose(out, ref, atol=1e-4, rtol=1e-4), \
        f"max abs err {jnp.max(jnp.abs(out - ref))}"
    print("KERNEL_OK")
</pallas_src>

<mosaic_0001>
module attributes {stable_mosaic.version = 11 : i64} {
  func.func @encoder_layer_kernel(%arg0: memref<16x32xf32, #tpu.memory_space<vmem>>, %arg1: memref<32x192xf32, #tpu.memory_space<vmem>>, %arg2: memref<32x64xf32, #tpu.memory_space<vmem>>, %arg3: memref<64x32xf32, #tpu.memory_space<vmem>>, %arg4: memref<9x64xf32, #tpu.memory_space<vmem>>, %arg5: memref<16x32xf32, #tpu.memory_space<vmem>>) attributes {dimension_semantics = [], scalar_prefetch = 0 : i64, scratch_operands = 0 : i64, tpu.core_type = #tpu.core_type<tc>} {
    %c0 = arith.constant 0 : index
    %c0_0 = arith.constant 0 : index
    %0 = vector.load %arg0[%c0, %c0_0] : memref<16x32xf32, #tpu.memory_space<vmem>>, vector<16x32xf32>
    %c0_1 = arith.constant 0 : index
    %c0_2 = arith.constant 0 : index
    %1 = vector.load %arg4[%c0_1, %c0_2] : memref<9x64xf32, #tpu.memory_space<vmem>>, vector<9x64xf32>
    %2 = vector.extract_strided_slice %1 {offsets = [0, 0], sizes = [1, 32], strides = [1, 1]} : vector<9x64xf32> to vector<1x32xf32>
    %3 = vector.extract_strided_slice %1 {offsets = [1, 0], sizes = [1, 32], strides = [1, 1]} : vector<9x64xf32> to vector<1x32xf32>
    %4 = vector.extract_strided_slice %1 {offsets = [2, 0], sizes = [1, 32], strides = [1, 1]} : vector<9x64xf32> to vector<1x32xf32>
    %5 = vector.extract_strided_slice %1 {offsets = [3, 0], sizes = [1, 32], strides = [1, 1]} : vector<9x64xf32> to vector<1x32xf32>
    %6 = vector.extract_strided_slice %1 {offsets = [4, 0], sizes = [1, 32], strides = [1, 1]} : vector<9x64xf32> to vector<1x32xf32>
    %7 = vector.extract_strided_slice %1 {offsets = [5, 0], sizes = [1, 64], strides = [1, 1]} : vector<9x64xf32> to vector<1x64xf32>
    %8 = vector.extract_strided_slice %1 {offsets = [6, 0], sizes = [1, 32], strides = [1, 1]} : vector<9x64xf32> to vector<1x32xf32>
    %9 = vector.extract_strided_slice %1 {offsets = [7, 0], sizes = [1, 32], strides = [1, 1]} : vector<9x64xf32> to vector<1x32xf32>
    %10 = vector.extract_strided_slice %1 {offsets = [8, 0], sizes = [1, 32], strides = [1, 1]} : vector<9x64xf32> to vector<1x32xf32>
    %c0_3 = arith.constant 0 : index
    %c0_4 = arith.constant 0 : index
    %11 = vector.load %arg1[%c0_3, %c0_4] : memref<32x192xf32, #tpu.memory_space<vmem>>, vector<32x192xf32>
    %cst = arith.constant dense<0.000000e+00> : vector<16x192xf32>
    %12 = tpu.matmul %0, %11, %cst {dimension_numbers = #tpu.dot_dimension_numbers<[1], [0], [0], [1], [0, 0, 1, 1], [], []>} : vector<16x32xf32>, vector<32x192xf32>, vector<16x192xf32> -> vector<16x192xf32>
    %13 = vector.extract_strided_slice %12 {offsets = [0, 0], sizes = [16, 128], strides = [1, 1]} : vector<16x192xf32> to vector<16x128xf32>
    %14 = vector.shape_cast %13 : vector<16x128xf32> to vector<2x8x128xf32>
    %15 = vector.extract_strided_slice %12 {offsets = [0, 128], sizes = [16, 32], strides = [1, 1]} : vector<16x192xf32> to vector<16x32xf32>
    %16 = vector.broadcast %2 : vector<1x32xf32> to vector<16x32xf32>
    %17 = arith.addf %15, %16 : vector<16x32xf32>
    %18 = vector.shape_cast %17 : vector<16x32xf32> to vector<2x8x32xf32>
    %19 = vector.extract_strided_slice %12 {offsets = [0, 160], sizes = [16, 32], strides = [1, 1]} : vector<16x192xf32> to vector<16x32xf32>
    %20 = vector.broadcast %3 : vector<1x32xf32> to vector<16x32xf32>
    %21 = arith.addf %19, %20 : vector<16x32xf32>
    %22 = vector.shape_cast %21 : vector<16x32xf32> to vector<2x8x32xf32>
    %cst_5 = arith.constant 0.000000e+00 : f32
    %23 = vector.broadcast %cst_5 : f32 to vector<2x8x32xf32>
    %24 = vector.extract_strided_slice %18 {offsets = [0, 0, 0], sizes = [2, 8, 8], strides = [1, 1, 1]} : vector<2x8x32xf32> to vector<2x8x8xf32>
    %25 = vector.extract_strided_slice %22 {offsets = [0, 0, 0], sizes = [2, 8, 8], strides = [1, 1, 1]} : vector<2x8x32xf32> to vector<2x8x8xf32>
    "tpu.trace_start"() <{level = 10 : i32, message = "bqd,bkd->bqk"}> : () -> ()
    %cst_6 = arith.constant dense<0.000000e+00> : vector<2x8x8xf32>
    %26 = tpu.matmul %24, %25, %cst_6 {dimension_numbers = #tpu.dot_dimension_numbers<[2], [2], [1], [1], [0, 0, 0, 1, 1, 1], [0], [0]>} : vector<2x8x8xf32>, vector<2x8x8xf32>, vector<2x8x8xf32> -> vector<2x8x8xf32>
    "tpu.trace_stop"() : () -> ()
    %cst_7 = arith.constant dense<0xFF800000> : vector<2x8xf32>
    %27 = vector.multi_reduction <maximumf>, %26, %cst_7 [2] : vector<2x8x8xf32> to vector<2x8xf32>
    %28 = vector.shape_cast %27 : vector<2x8xf32> to vector<2x8x1xf32>
    %29 = vector.broadcast %28 : vector<2x8x1xf32> to vector<2x8x8xf32>
    %30 = arith.subf %26, %29 : vector<2x8x8xf32>
    %31 = math.exp %30 : vector<2x8x8xf32>
    %cst_8 = arith.constant dense<0.000000e+00> : vector<2x8xf32>
    %32 = vector.multi_reduction <add>, %31, %cst_8 [2] : vector<2x8x8xf32> to vector<2x8xf32>
    %33 = vector.shape_cast %32 : vector<2x8xf32> to vector<2x8x1xf32>
    %34 = tpu.reciprocal %33 : vector<2x8x1xf32> -> vector<2x8x1xf32>
    %35 = vector.broadcast %34 : vector<2x8x1xf32> to vector<2x8x8xf32>
    %36 = arith.mulf %31, %35 : vector<2x8x8xf32>
    %37 = vector.extract_strided_slice %14 {offsets = [0, 0, 0], sizes = [2, 8, 32], strides = [1, 1, 1]} : vector<2x8x128xf32> to vector<2x8x32xf32>
    "tpu.trace_start"() <{level = 10 : i32, message = "bqk,bkd->bqd"}> : () -> ()
    %cst_9 = arith.constant dense<0.000000e+00> : vector<2x8x32xf32>
    %38 = tpu.matmul %36, %37, %cst_9 {dimension_numbers = #tpu.dot_dimension_numbers<[2], [1], [1], [2], [0, 0, 0, 1, 1, 2], [0], [0]>} : vector<2x8x8xf32>, vector<2x8x32xf32>, vector<2x8x32xf32> -> vector<2x8x32xf32>
    "tpu.trace_stop"() : () -> ()
    %39 = arith.addf %23, %38 : vector<2x8x32xf32>
    %40 = vector.extract_strided_slice %18 {offsets = [0, 0, 8], sizes = [2, 8, 8], strides = [1, 1, 1]} : vector<2x8x32xf32> to vector<2x8x8xf32>
    %41 = vector.extract_strided_slice %22 {offsets = [0, 0, 8], sizes = [2, 8, 8], strides = [1, 1, 1]} : vector<2x8x32xf32> to vector<2x8x8xf32>
    "tpu.trace_start"() <{level = 10 : i32, message = "bqd,bkd->bqk"}> : () -> ()
    %cst_10 = arith.constant dense<0.000000e+00> : vector<2x8x8xf32>
    %42 = tpu.matmul %40, %41, %cst_10 {dimension_numbers = #tpu.dot_dimension_numbers<[2], [2], [1], [1], [0, 0, 0, 1, 1, 1], [0], [0]>} : vector<2x8x8xf32>, vector<2x8x8xf32>, vector<2x8x8xf32> -> vector<2x8x8xf32>
    "tpu.trace_stop"() : () -> ()
    %cst_11 = arith.constant dense<0xFF800000> : vector<2x8xf32>
    %43 = vector.multi_reduction <maximumf>, %42, %cst_11 [2] : vector<2x8x8xf32> to vector<2x8xf32>
    %44 = vector.shape_cast %43 : vector<2x8xf32> to vector<2x8x1xf32>
    %45 = vector.broadcast %44 : vector<2x8x1xf32> to vector<2x8x8xf32>
    %46 = arith.subf %42, %45 : vector<2x8x8xf32>
    %47 = math.exp %46 : vector<2x8x8xf32>
    %cst_12 = arith.constant dense<0.000000e+00> : vector<2x8xf32>
    %48 = vector.multi_reduction <add>, %47, %cst_12 [2] : vector<2x8x8xf32> to vector<2x8xf32>
    %49 = vector.shape_cast %48 : vector<2x8xf32> to vector<2x8x1xf32>
    %50 = tpu.reciprocal %49 : vector<2x8x1xf32> -> vector<2x8x1xf32>
    %51 = vector.broadcast %50 : vector<2x8x1xf32> to vector<2x8x8xf32>
    %52 = arith.mulf %47, %51 : vector<2x8x8xf32>
    %53 = vector.extract_strided_slice %14 {offsets = [0, 0, 32], sizes = [2, 8, 32], strides = [1, 1, 1]} : vector<2x8x128xf32> to vector<2x8x32xf32>
    "tpu.trace_start"() <{level = 10 : i32, message = "bqk,bkd->bqd"}> : () -> ()
    %cst_13 = arith.constant dense<0.000000e+00> : vector<2x8x32xf32>
    %54 = tpu.matmul %52, %53, %cst_13 {dimension_numbers = #tpu.dot_dimension_numbers<[2], [1], [1], [2], [0, 0, 0, 1, 1, 2], [0], [0]>} : vector<2x8x8xf32>, vector<2x8x32xf32>, vector<2x8x32xf32> -> vector<2x8x32xf32>
    "tpu.trace_stop"() : () -> ()
    %55 = arith.addf %39, %54 : vector<2x8x32xf32>
    %56 = vector.extract_strided_slice %18 {offsets = [0, 0, 16], sizes = [2, 8, 8], strides = [1, 1, 1]} : vector<2x8x32xf32> to vector<2x8x8xf32>
    %57 = vector.extract_strided_slice %22 {offsets = [0, 0, 16], sizes = [2, 8, 8], strides = [1, 1, 1]} : vector<2x8x32xf32> to vector<2x8x8xf32>
    "tpu.trace_start"() <{level = 10 : i32, message = "bqd,bkd->bqk"}> : () -> ()
    %cst_14 = arith.constant dense<0.000000e+00> : vector<2x8x8xf32>
    %58 = tpu.matmul %56, %57, %cst_14 {dimension_numbers = #tpu.dot_dimension_numbers<[2], [2], [1], [1], [0, 0, 0, 1, 1, 1], [0], [0]>} : vector<2x8x8xf32>, vector<2x8x8xf32>, vector<2x8x8xf32> -> vector<2x8x8xf32>
    "tpu.trace_stop"() : () -> ()
    %cst_15 = arith.constant dense<0xFF800000> : vector<2x8xf32>
    %59 = vector.multi_reduction <maximumf>, %58, %cst_15 [2] : vector<2x8x8xf32> to vector<2x8xf32>
    %60 = vector.shape_cast %59 : vector<2x8xf32> to vector<2x8x1xf32>
    %61 = vector.broadcast %60 : vector<2x8x1xf32> to vector<2x8x8xf32>
    %62 = arith.subf %58, %61 : vector<2x8x8xf32>
    %63 = math.exp %62 : vector<2x8x8xf32>
    %cst_16 = arith.constant dense<0.000000e+00> : vector<2x8xf32>
    %64 = vector.multi_reduction <add>, %63, %cst_16 [2] : vector<2x8x8xf32> to vector<2x8xf32>
    %65 = vector.shape_cast %64 : vector<2x8xf32> to vector<2x8x1xf32>
    %66 = tpu.reciprocal %65 : vector<2x8x1xf32> -> vector<2x8x1xf32>
    %67 = vector.broadcast %66 : vector<2x8x1xf32> to vector<2x8x8xf32>
    %68 = arith.mulf %63, %67 : vector<2x8x8xf32>
    %69 = vector.extract_strided_slice %14 {offsets = [0, 0, 64], sizes = [2, 8, 32], strides = [1, 1, 1]} : vector<2x8x128xf32> to vector<2x8x32xf32>
    "tpu.trace_start"() <{level = 10 : i32, message = "bqk,bkd->bqd"}> : () -> ()
    %cst_17 = arith.constant dense<0.000000e+00> : vector<2x8x32xf32>
    %70 = tpu.matmul %68, %69, %cst_17 {dimension_numbers = #tpu.dot_dimension_numbers<[2], [1], [1], [2], [0, 0, 0, 1, 1, 2], [0], [0]>} : vector<2x8x8xf32>, vector<2x8x32xf32>, vector<2x8x32xf32> -> vector<2x8x32xf32>
    "tpu.trace_stop"() : () -> ()
    %71 = arith.addf %55, %70 : vector<2x8x32xf32>
    %72 = vector.extract_strided_slice %18 {offsets = [0, 0, 24], sizes = [2, 8, 8], strides = [1, 1, 1]} : vector<2x8x32xf32> to vector<2x8x8xf32>
    %73 = vector.extract_strided_slice %22 {offsets = [0, 0, 24], sizes = [2, 8, 8], strides = [1, 1, 1]} : vector<2x8x32xf32> to vector<2x8x8xf32>
    "tpu.trace_start"() <{level = 10 : i32, message = "bqd,bkd->bqk"}> : () -> ()
    %cst_18 = arith.constant dense<0.000000e+00> : vector<2x8x8xf32>
    %74 = tpu.matmul %72, %73, %cst_18 {dimension_numbers = #tpu.dot_dimension_numbers<[2], [2], [1], [1], [0, 0, 0, 1, 1, 1], [0], [0]>} : vector<2x8x8xf32>, vector<2x8x8xf32>, vector<2x8x8xf32> -> vector<2x8x8xf32>
    "tpu.trace_stop"() : () -> ()
    %cst_19 = arith.constant dense<0xFF800000> : vector<2x8xf32>
    %75 = vector.multi_reduction <maximumf>, %74, %cst_19 [2] : vector<2x8x8xf32> to vector<2x8xf32>
    %76 = vector.shape_cast %75 : vector<2x8xf32> to vector<2x8x1xf32>
    %77 = vector.broadcast %76 : vector<2x8x1xf32> to vector<2x8x8xf32>
    %78 = arith.subf %74, %77 : vector<2x8x8xf32>
    %79 = math.exp %78 : vector<2x8x8xf32>
    %cst_20 = arith.constant dense<0.000000e+00> : vector<2x8xf32>
    %80 = vector.multi_reduction <add>, %79, %cst_20 [2] : vector<2x8x8xf32> to vector<2x8xf32>
    %81 = vector.shape_cast %80 : vector<2x8xf32> to vector<2x8x1xf32>
    %82 = tpu.reciprocal %81 : vector<2x8x1xf32> -> vector<2x8x1xf32>
    %83 = vector.broadcast %82 : vector<2x8x1xf32> to vector<2x8x8xf32>
    %84 = arith.mulf %79, %83 : vector<2x8x8xf32>
    %85 = vector.extract_strided_slice %14 {offsets = [0, 0, 96], sizes = [2, 8, 32], strides = [1, 1, 1]} : vector<2x8x128xf32> to vector<2x8x32xf32>
    "tpu.trace_start"() <{level = 10 : i32, message = "bqk,bkd->bqd"}> : () -> ()
    %cst_21 = arith.constant dense<0.000000e+00> : vector<2x8x32xf32>
    %86 = tpu.matmul %84, %85, %cst_21 {dimension_numbers = #tpu.dot_dimension_numbers<[2], [1], [1], [2], [0, 0, 0, 1, 1, 2], [0], [0]>} : vector<2x8x8xf32>, vector<2x8x32xf32>, vector<2x8x32xf32> -> vector<2x8x32xf32>
    "tpu.trace_stop"() : () -> ()
    %87 = arith.addf %71, %86 : vector<2x8x32xf32>
    %88 = vector.shape_cast %87 : vector<2x8x32xf32> to vector<16x32xf32>
    %89 = vector.broadcast %4 : vector<1x32xf32> to vector<16x32xf32>
    %90 = arith.addf %88, %89 : vector<16x32xf32>
    %91 = arith.addf %0, %90 : vector<16x32xf32>
    %cst_22 = arith.constant dense<0.000000e+00> : vector<16xf32>
    %92 = vector.multi_reduction <add>, %91, %cst_22 [1] : vector<16x32xf32> to vector<16xf32>
    %93 = vector.shape_cast %92 : vector<16xf32> to vector<16x1xf32>
    %cst_23 = arith.constant 3.200000e+01 : f32
    %94 = vector.broadcast %cst_23 : f32 to vector<16x1xf32>
    %95 = arith.divf %93, %94 : vector<16x1xf32>
    %96 = vector.broadcast %95 : vector<16x1xf32> to vector<16x32xf32>
    %97 = arith.subf %91, %96 : vector<16x32xf32>
    %98 = arith.mulf %97, %97 : vector<16x32xf32>
    %cst_24 = arith.constant dense<0.000000e+00> : vector<16xf32>
    %99 = vector.multi_reduction <add>, %98, %cst_24 [1] : vector<16x32xf32> to vector<16xf32>
    %100 = vector.shape_cast %99 : vector<16xf32> to vector<16x1xf32>
    %cst_25 = arith.constant 3.200000e+01 : f32
    %101 = vector.broadcast %cst_25 : f32 to vector<16x1xf32>
    %102 = arith.divf %100, %101 : vector<16x1xf32>
    %cst_26 = arith.constant 9.99999974E-6 : f32
    %103 = vector.broadcast %cst_26 : f32 to vector<16x1xf32>
    %104 = arith.addf %102, %103 : vector<16x1xf32>
    %105 = math.rsqrt %104 : vector<16x1xf32>
    %106 = vector.broadcast %95 : vector<16x1xf32> to vector<16x32xf32>
    %107 = arith.subf %91, %106 : vector<16x32xf32>
    %108 = vector.broadcast %105 : vector<16x1xf32> to vector<16x32xf32>
    %109 = arith.mulf %107, %108 : vector<16x32xf32>
    %110 = vector.broadcast %5 : vector<1x32xf32> to vector<16x32xf32>
    %111 = arith.mulf %109, %110 : vector<16x32xf32>
    %112 = vector.broadcast %6 : vector<1x32xf32> to vector<16x32xf32>
    %113 = arith.addf %111, %112 : vector<16x32xf32>
    %c0_27 = arith.constant 0 : index
    %c0_28 = arith.constant 0 : index
    %114 = vector.load %arg2[%c0_27, %c0_28] : memref<32x64xf32, #tpu.memory_space<vmem>>, vector<32x64xf32>
    %cst_29 = arith.constant dense<0.000000e+00> : vector<16x64xf32>
    %115 = tpu.matmul %113, %114, %cst_29 {dimension_numbers = #tpu.dot_dimension_numbers<[1], [0], [0], [1], [0, 0, 1, 1], [], []>} : vector<16x32xf32>, vector<32x64xf32>, vector<16x64xf32> -> vector<16x64xf32>
    %116 = vector.broadcast %7 : vector<1x64xf32> to vector<16x64xf32>
    %117 = arith.addf %115, %116 : vector<16x64xf32>
    %cst_30 = arith.constant 0.000000e+00 : f32
    %118 = vector.broadcast %cst_30 : f32 to vector<16x64xf32>
    %119 = arith.maximumf %117, %118 : vector<16x64xf32>
    %c0_31 = arith.constant 0 : index
    %c0_32 = arith.constant 0 : index
    %120 = vector.load %arg3[%c0_31, %c0_32] : memref<64x32xf32, #tpu.memory_space<vmem>>, vector<64x32xf32>
    %cst_33 = arith.constant dense<0.000000e+00> : vector<16x32xf32>
    %121 = tpu.matmul %119, %120, %cst_33 {dimension_numbers = #tpu.dot_dimension_numbers<[1], [0], [0], [1], [0, 0, 1, 1], [], []>} : vector<16x64xf32>, vector<64x32xf32>, vector<16x32xf32> -> vector<16x32xf32>
    %122 = vector.broadcast %8 : vector<1x32xf32> to vector<16x32xf32>
    %123 = arith.addf %121, %122 : vector<16x32xf32>
    %124 = arith.addf %113, %123 : vector<16x32xf32>
    %cst_34 = arith.constant dense<0.000000e+00> : vector<16xf32>
    %125 = vector.multi_reduction <add>, %124, %cst_34 [1] : vector<16x32xf32> to vector<16xf32>
    %126 = vector.shape_cast %125 : vector<16xf32> to vector<16x1xf32>
    %cst_35 = arith.constant 3.200000e+01 : f32
    %127 = vector.broadcast %cst_35 : f32 to vector<16x1xf32>
    %128 = arith.divf %126, %127 : vector<16x1xf32>
    %129 = vector.broadcast %128 : vector<16x1xf32> to vector<16x32xf32>
    %130 = arith.subf %124, %129 : vector<16x32xf32>
    %131 = arith.mulf %130, %130 : vector<16x32xf32>
    %cst_36 = arith.constant dense<0.000000e+00> : vector<16xf32>
    %132 = vector.multi_reduction <add>, %131, %cst_36 [1] : vector<16x32xf32> to vector<16xf32>
    %133 = vector.shape_cast %132 : vector<16xf32> to vector<16x1xf32>
    %cst_37 = arith.constant 3.200000e+01 : f32
    %134 = vector.broadcast %cst_37 : f32 to vector<16x1xf32>
    %135 = arith.divf %133, %134 : vector<16x1xf32>
    %cst_38 = arith.constant 9.99999974E-6 : f32
    %136 = vector.broadcast %cst_38 : f32 to vector<16x1xf32>
    %137 = arith.addf %135, %136 : vector<16x1xf32>
    %138 = math.rsqrt %137 : vector<16x1xf32>
    %139 = vector.broadcast %128 : vector<16x1xf32> to vector<16x32xf32>
    %140 = arith.subf %124, %139 : vector<16x32xf32>
    %141 = vector.broadcast %138 : vector<16x1xf32> to vector<16x32xf32>
    %142 = arith.mulf %140, %141 : vector<16x32xf32>
    %143 = vector.broadcast %9 : vector<1x32xf32> to vector<16x32xf32>
    %144 = arith.mulf %142, %143 : vector<16x32xf32>
    %145 = vector.broadcast %10 : vector<1x32xf32> to vector<16x32xf32>
    %146 = arith.addf %144, %145 : vector<16x32xf32>
    %c0_39 = arith.constant 0 : index
    %c0_40 = arith.constant 0 : index
    %147 = vector.load %arg5[%c0_39, %c0_40] : memref<16x32xf32, #tpu.memory_space<vmem>>, vector<16x32xf32>
    tpu.vector_store %arg5[%c0_39, %c0_40], %146 {strides = array<i32>} : memref<16x32xf32, #tpu.memory_space<vmem>>, vector<16x32xf32>,
    return
  }
}

</mosaic_0001>

<bundles_post_ra>
// kernel: encoder_layer.1
= control target key start
LH: loop header
LB: loop body
LE: loop exit
PB: predicated region body
PF: predicated region fallthrough
CT: control target
= control target key end

     0   :  { %10 = vsyncpa [#allocation3], 0  ;;  %s2398_s0 = inlined_call_operand.hbm [shape: f32[16,32], index: 0, kind: input, shape index: {}]   ;;  %s2399_s1 = inlined_call_operand.vmem [shape: f32[32,192], index: 1, kind: input, shape index: {}]   ;;  %s2400_s2 = inlined_call_operand.vmem [shape: f32[32,64], index: 2, kind: input, shape index: {}]   ;;  %s2401_s3 = inlined_call_operand.vmem [shape: f32[64,32], index: 3, kind: input, shape index: {}]   ;;  %s2402_s4 = inlined_call_operand.hbm [shape: f32[9,64], index: 4, kind: input, shape index: {}]   ;;  %s2403_s5 = inlined_call_operand.hbm [shape: f32[16,32], index: 5, kind: output, shape index: {}]  }
   0x1   :  { %11 = vsyncpa [#allocation6], 0 }
   0x2   :  { %12 = vsyncpa [#allocation4], 0  ;;  %s2093_s18 = smov [#allocation2]  }
   0x3   :  { %s18_s19 = sshll.u32 %s2093_s18, 4  ;;  %s19_s19 = int_to_ptr.vmem [resolvable:$true] %s18_s19 }
   0x4   :  { %s2035_s20 = scalar_lea.vmem %s19_s19, 256  ;;  %p2040_p1 = scmp.lt.s32.totalorder %s19_s19, %s19_s19 }
   0x5   :  { %p2036_p0 = scmp.ne.s32.totalorder %s19_s19, %s2035_s20  ;;  %p2041_p2 = scmp.lt.s32.totalorder %s2035_s20, %s2035_s20 }
   0x7   :  { %p2042_p3 = por %p2041_p2, %p2040_p1 }
   0x9   :  { %p2043_p4 = pnand %p2042_p3, %p2036_p0 }
   0xb   :  { %2046 = shalt.err (!%p2043_p4)
}
   0xc   :  { %s2094_s21 = smov 128   ;;  %s2095_s22 = smov 8  }
   0xd   :  { %24 = dma.hbm_to_vmem [thread:$0]  %s2398_s0, 256, %s19_s19, [#allocation3], %s2094_s21, %s2094_s21, %s2095_s22  }
   0xe   :  { %s2096_s25 = smov [#allocation5]  }
   0xf   :  { %s36_s26 = sshll.u32 %s2096_s25, 4  ;;  %s37_s26 = int_to_ptr.vmem [resolvable:$true] %s36_s26 }
  0x10   :  { %s2055_s27 = scalar_lea.vmem %s37_s26, 256  ;;  %p2060_p6 = scmp.lt.s32.totalorder %s37_s26, %s37_s26 }
  0x11   :  { %p2056_p5 = scmp.ne.s32.totalorder %s37_s26, %s2055_s27  ;;  %p2061_p7 = scmp.lt.s32.totalorder %s2055_s27, %s2055_s27 }
  0x13   :  { %p2062_p8 = por %p2061_p7, %p2060_p6 }
  0x15   :  { %p2063_p9 = pnand %p2062_p8, %p2056_p5 }
  0x17   :  { %2066 = shalt.err (!%p2063_p9)
}
  0x18   :  { %42 = dma.hbm_to_vmem [thread:$0]  %s2402_s4, 256, %s37_s26, [#allocation6], %s2094_s21, %s2094_s21, %s2095_s22  }
  0x19   :  { %2087 = dma.done.wait [#allocation3], 256  }
  0x1a   :  { %2088 = vsyncadd [#allocation3], 4294967040 }
  0x1b   :  { %2089 = dma.done.wait [#allocation6], 256  }
  0x1c   :  { %2090 = vsyncadd [#allocation6], 4294967040  ;;  %v2097_v0 = vmov 0.0   ;;  %v145_v1 = vlaneseq  ;;  %v60_v3 = vld [vmem:[%s2399_s1 + $0x38] sm:$0xff]  ;;  %v59_v4 = vld [vmem:[%s2399_s1 + $0x30] sm:$0xff]  ;;  %vm61_vm0 = vcmask 261120  }
  0x1d   :  { %132 = vmatprep.mubr.f32.mxu0 %v2097_v0  ;;  %138 = vmatprep.mubr.f32.mxu1 %v2097_v0  ;;  %v58_v5 = vld [vmem:[%s2399_s1 + $0x28] sm:$0xff]  ;;  %v57_v6 = vld [vmem:[%s2399_s1 + $0x20] sm:$0xff]  ;;  %v56_v7 = vld [vmem:[%s2399_s1 + $0x18] sm:$0xff]  ;;  %vm2099_vm1 = vmmov 0   ;;  %s2100_s19 = smov 96   ;;  %s2101_s20 = smov 88  }
  0x1e   :  { %v2153_v2 = vshrl.u32 %v145_v1, 7  ;;  %92 = vmatprep.subr.mxu0 %v60_v3  ;;  %1963 = vmatprep.subr.mxu1 %v60_v3  ;;  %v55_v9 = vld [vmem:[%s2399_s1 + $0x10] sm:$0xff]  ;;  %v54_v11 = vld [vmem:[%s2399_s1 + $0x8] sm:$0xff]  ;;  %v53_v12 = vld [vmem:[%s2399_s1] sm:$0xff]  ;;  %s2098_s1 = smov 32   ;;  %s2102_s23 = smov 120  }
  0x1f   :  { %93 = vmatpush1.msra.mxu0 %v59_v4  ;;  %1967 = vmatpush1.msra.mxu1 %v59_v4  ;;  %v2174_v10 = vld [vmem:[#allocation5] sm:$0xff]  ;;  %v2182_v13 = vld [vmem:[#allocation2] sm:$0xff]  ;;  %v2184_v14 = vld [vmem:[#allocation2 + $0x8] sm:$0xff]  ;;  %vm164_vm2 = vcmask 64512   ;;  %s2103_s24 = smov 80   ;;  %s2104_s25 = smov 112  }
  0x20   :  { %v153_v8 = vsub.s32 1, %v2153_v2  ;;  %94 = vmatprep.subr.mxu0 %v58_v5  ;;  %1964 = vmatprep.subr.mxu1 %v58_v5  ;;  %v147_v21 = vsub.s32 0, %v2153_v2  ;;  %s2105_s26 = smov 64   ;;  %s2106_s27 = smov 72   ;;  %vm1632_vm3 = vcmask 523264  }
  0x21   :  { %95 = vmatpush1.msra.mxu0 %v57_v6  ;;  %1968 = vmatpush1.msra.mxu1 %v57_v6  ;;  %s2107_s28 = smov 104  }
  0x22   :  { %96 = vmatprep.subr.mxu0 %v56_v7  ;;  %1965 = vmatprep.subr.mxu1 %v56_v7  ;;  %v154_v15 = vrot.slane %v2174_v10, %v153_v8  ;;  %v148_v24 = vrot.slane %v2174_v10, %v147_v21 }
  0x23   :  { %97 = vmatpush1.msra.mxu0 %v55_v9  ;;  %1969 = vmatpush1.msra.mxu1 %v55_v9 }
  0x24   :  { %98 = vmatprep.subr.mxu0 %v54_v11  ;;  %1966 = vmatprep.subr.mxu1 %v54_v11 }
  0x25   :  { %99 = vmatpush1.msra.mxu0 %v53_v12  ;;  %1970 = vmatpush1.msra.mxu1 %v53_v12 }
  0x26   :  { %1774 = vmatmul.mubr.msk.f32.vlgmr.msra.gmra.mxu0 %vm61_vm0, %v2182_v13  ;;  %1775 = vmatmul.mubr.msk.f32.vlgmr.msra.gmra.mxu1 %vm61_vm0, %v2184_v14 }
  0x27   :  { %156 = vrot.lane.b32.xlu0 %v154_v15, %s2098_s1  ;;  %1853 = vmatprep.subr.mxu1 %v2097_v0 }
  0x28   :  { %1868 = vmatprep.subr.mxu0 %v2097_v0  ;;  %1855 = vmatprep.mubr.msk.f32.mxu1 %vm2099_vm1, %v2097_v0 }
  0x29   :  { %1870 = vmatprep.mubr.msk.f32.mxu0 %vm2099_vm1, %v2097_v0 }
  0x99   :  { %v157_v16 = vpop.permute.xlu0 %156 }
  0xe6   :  { %v2198_v17 = vpop.f32.mrf.mxu0  ;;  %v2200_v18 = vpop.f32.mrf.mxu1 }
  0xe8   :  { %v136_v19 = vpop.f32.mrf.mxu0  ;;  %v142_v20 = vpop.f32.mrf.mxu1 }
  0xe9   :  { %v2203_v22 = vadd.f32 %v157_v16, %v136_v19  ;;  %v2205_v23 = vadd.f32 %v157_v16, %v142_v20  ;;  %v2214_v25 = vadd.f32 %v148_v24, %v136_v19  ;;  %v2216_v26 = vadd.f32 %v148_v24, %v142_v20 }
  0xeb   :  { %241 = vrot.lane.b32.xlu1 %v2205_v23, %s2100_s19  ;;  %162 = vrot.lane.b32.xlu0 %v2203_v22, %s2100_s19 }
  0xef   :  { %342 = vrot.lane.b32.xlu1 %v2203_v22, %s2101_s20  ;;  %420 = vrot.lane.b32.xlu0 %v2205_v23, %s2101_s20 }
  0xf3   :  { %418 = vrot.lane.b32.xlu0 %v2216_v26, %s2102_s23  ;;  %340 = vrot.lane.b32.xlu1 %v2214_v25, %s2102_s23 }
 0x15d   :  { %v242_v27 = vpop.permute.xlu1 %241  ;;  %v163_v28 = vpop.permute.xlu0 %162 }
 0x15e   :  { %1854 = vmatpush3.xpose.msk.msra.mxu1 %vm164_vm2, %v163_v28 }
 0x15f   :  { %1858 = vmatprep.subr.mxu1 %v2097_v0 }
 0x161   :  { %v421_v29 = vpop.permute.xlu0 %420  ;;  %1856 = vmatmul.mubr.msk.f32.vlgmr.msra.gmra.mxu1 %vm164_vm2, %v2214_v25  ;;  %v343_v30 = vpop.permute.xlu1 %342 }
 0x162   :  { %1859 = vmatpush3.xpose.msk.msra.mxu1 %vm164_vm2, %v242_v27  ;;  %1869 = vmatpush3.xpose.msk.msra.mxu0 %vm164_vm2, %v421_v29 }
 0x163   :  { %1860 = vmatprep.mubr.msk.f32.mxu1 %vm2099_vm1, %v2097_v0  ;;  %1863 = vmatprep.subr.mxu1 %v2097_v0 }
 0x164   :  { %1878 = vmatprep.subr.mxu0 %v2097_v0 }
 0x165   :  { %v419_v31 = vpop.permute.xlu0 %418  ;;  %1861 = vmatmul.mubr.msk.f32.vlgmr.msra.gmra.mxu1 %vm164_vm2, %v2216_v26  ;;  %v341_v32 = vpop.permute.xlu1 %340 }
 0x166   :  { %1864 = vmatpush3.xpose.msk.msra.mxu1 %vm164_vm2, %v343_v30  ;;  %1871 = vmatmul.mubr.msk.f32.vlgmr.msra.gmra.mxu0 %vm164_vm2, %v419_v31 }
 0x167   :  { %1865 = vmatprep.mubr.msk.f32.mxu1 %vm2099_vm1, %v2097_v0  ;;  %1873 = vmatprep.subr.mxu1 %v2097_v0 }
 0x168   :  { %1880 = vmatprep.mubr.msk.f32.mxu0 %vm2099_vm1, %v2097_v0 }
 0x169   :  { %1866 = vmatmul.mubr.msk.f32.vlgmr.msra.gmra.mxu1 %vm164_vm2, %v341_v32 }
 0x16a   :  { %1875 = vmatprep.mubr.msk.f32.mxu1 %vm2099_vm1, %v2097_v0 }
 0x221   :  { %v236_v33 = vpop.f32.mrf.mxu1 }
 0x222   :  { %v318_v43 = vsel %vm164_vm2, %v236_v33, -inf }
 0x223   :  { %v1857_v34 = vpop.f32.mrf.mxu1 }
 0x225   :  { %v314_v35 = vpop.f32.mrf.mxu1 }
 0x226   :  { %v492_v36 = vpop.f32.mrf.mxu0  ;;  %v321_v44 = vsel %vm164_vm2, %v314_v35, -inf }
 0x227   :  { %v1862_v37 = vpop.f32.mrf.mxu1  ;;  %v499_v38 = vsel %vm164_vm2, %v492_v36, -inf }
 0x228   :  { %500 = vmax.xlane.f32.xlu0 %v499_v38  ;;  %v1872_v39 = vpop.f32.mrf.mxu0 }
 0x229   :  { %v414_v40 = vpop.f32.mrf.mxu1 }
 0x22a   :  { %v496_v41 = vsel %vm164_vm2, %v414_v40, -inf }
 0x22b   :  { %497 = vmax.xlane.f32.xlu1 %v496_v41  ;;  %v1867_v42 = vpop.f32.mrf.mxu1 }
 0x22c   :  { %319 = vmax.xlane.f32.xlu0 %v318_v43 }
 0x22f   :  { %322 = vmax.xlane.f32.xlu1 %v321_v44 }
 0x2b1   :  { %v501_v45 = vpop.xlane.xlu0 %500 }
 0x2b2   :  { %v503_v46 = vsub.f32 %v492_v36, %v501_v45 }
 0x2b4   :  { %v506_v47 = vmul.f32 1.442695, %v503_v46  ;;  %v498_v48 = vpop.xlane.xlu1 %497 }
 0x2b5   :  { %v502_v49 = vsub.f32 %v414_v40, %v498_v48  ;;  %v320_v50 = vpop.xlane.xlu0 %319 }
 0x2b6   :  { %1987 = vpow2.f32 %v506_v47  ;;  %v324_v51 = vsub.f32 %v236_v33, %v320_v50 }
 0x2b7   :  { %v504_v52 = vmul.f32 1.442695, %v502_v49 }
 0x2b8   :  { %v326_v53 = vmul.f32 1.442695, %v324_v51  ;;  %v323_v54 = vpop.xlane.xlu1 %322 }
 0x2b9   :  { %v325_v55 = vsub.f32 %v314_v35, %v323_v54 }
 0x2ba   :  { %1989 = vpow2.f32 %v326_v53 }
 0x2bb   :  { %v328_v56 = vmul.f32 1.442695, %v325_v55  ;;  %1991 = vpow2.f32 %v504_v52 }
 0x2bd   :  { %1993 = vpow2.f32 %v328_v56 }
 0x2c3   :  { %v1988_v57 = vpop.eup %1987 }
 0x2c4   :  { %v511_v58 = vsel %vm164_vm2, %v1988_v57, 0.0 }
 0x2c5   :  { %512 = vadd.xlane.f32.xlu1 %v511_v58 }
 0x2c7   :  { %v1990_v59 = vpop.eup %1989 }
 0x2c8   :  { %v330_v60 = vsel %vm164_vm2, %v1990_v59, 0.0  ;;  %v1992_v61 = vpop.eup %1991 }
 0x2c9   :  { %331 = vadd.xlane.f32.xlu0 %v330_v60  ;;  %v508_v1 = vsel %vm164_vm2, %v1992_v61, 0.0 }
 0x2ca   :  { %v1994_v62 = vpop.eup %1993 }
 0x2cb   :  { %v333_v63 = vsel %vm164_vm2, %v1994_v62, 0.0 }
 0x2cc   :  { %334 = vadd.xlane.f32.xlu1 %v333_v63 }
 0x2cd   :  { %509 = vadd.xlane.f32.xlu0 %v508_v1 }
 0x2dd   :  { %596 = vrot.lane.b32.xlu1 %v2200_v18, %s2100_s19 }
 0x2e1   :  { %820 = vrot.lane.b32.xlu1 %v2203_v22, %s2103_s24 }
 0x2e3   :  { %519 = vrot.lane.b32.xlu0 %v2198_v17, %s2100_s19 }
 0x2e5   :  { %818 = vrot.lane.b32.xlu1 %v2214_v25, %s2104_s25 }
 0x2e7   :  { %898 = vrot.lane.b32.xlu0 %v2205_v23, %s2103_s24 }
 0x2eb   :  { %896 = vrot.lane.b32.xlu0 %v2216_v26, %s2104_s25 }
 0x34e   :  { %v513_v3 = vpop.xlane.xlu1 %512 }
 0x34f   :  { %1995 = vrcp.f32 %v513_v3 }
 0x352   :  { %v332_v4 = vpop.xlane.xlu0 %331 }
 0x355   :  { %v335_v5 = vpop.xlane.xlu1 %334 }
 0x356   :  { %1997 = vrcp.f32 %v335_v5  ;;  %v510_v6 = vpop.xlane.xlu0 %509 }
 0x357   :  { %1999 = vrcp.f32 %v510_v6 }
 0x358   :  { %2001 = vrcp.f32 %v332_v4 }
 0x359   :  { %v597_v7 = vpop.permute.xlu1 %596 }
 0x35a   :  { %v520_v8 = vpop.permute.xlu0 %519  ;;  %1879 = vmatpush3.msra.mxu0 %v597_v7 }
 0x35b   :  { %1874 = vmatpush3.msra.mxu1 %v520_v8  ;;  %1888 = vmatprep.subr.mxu0 %v2097_v0 }
 0x35c   :  { %v1996_v9 = vpop.eup %1995  ;;  %1883 = vmatprep.subr.mxu1 %v2097_v0 }
 0x35d   :  { %v517_v11 = vmul.f32 %v1996_v9, %v1988_v57  ;;  %v821_v24 = vpop.permute.xlu1 %820 }
 0x35e   :  { %v899_v15 = vpop.permute.xlu0 %898 }
 0x35f   :  { %1881 = vmatmul.mubr.msk.f32.vlgmr.msra.gmra.mxu0 %vm164_vm2, %v517_v11 }
 0x360   :  { %1889 = vmatpush3.msra.mxu0 %v2200_v18  ;;  %1890 = vmatprep.mubr.msk.f32.mxu0 %vm2099_vm1, %v2097_v0 }
 0x361   :  { %1898 = vmatprep.subr.mxu0 %v2097_v0  ;;  %v819_v29 = vpop.permute.xlu1 %818 }
 0x362   :  { %v897_v27 = vpop.permute.xlu0 %896 }
 0x363   :  { %v1998_v12 = vpop.eup %1997 }
 0x364   :  { %v2000_v16 = vpop.eup %1999  ;;  %v339_v19 = vmul.f32 %v1998_v12, %v1994_v62 }
 0x365   :  { %v516_v20 = vmul.f32 %v2000_v16, %v1992_v61  ;;  %v2002_v21 = vpop.eup %2001 }
 0x366   :  { %1891 = vmatmul.mubr.msk.f32.vlgmr.msra.gmra.mxu0 %vm164_vm2, %v339_v19  ;;  %v338_v28 = vmul.f32 %v2002_v21, %v1990_v59 }
 0x367   :  { %1899 = vmatpush3.xpose.msk.msra.mxu0 %vm164_vm2, %v899_v15  ;;  %1876 = vmatmul.mubr.msk.f32.vlgmr.msra.gmra.mxu1 %vm164_vm2, %v516_v20 }
 0x368   :  { %1884 = vmatpush3.msra.mxu1 %v2198_v17  ;;  %1900 = vmatprep.mubr.msk.f32.mxu0 %vm2099_vm1, %v2097_v0 }
 0x369   :  { %1885 = vmatprep.mubr.msk.f32.mxu1 %vm2099_vm1, %v2097_v0  ;;  %1893 = vmatprep.subr.mxu1 %v2097_v0 }
 0x36a   :  { %1901 = vmatmul.mubr.msk.f32.vlgmr.msra.gmra.mxu0 %vm164_vm2, %v897_v27  ;;  %1908 = vmatprep.subr.mxu0 %v2097_v0 }
 0x36b   :  { %1886 = vmatmul.mubr.msk.f32.vlgmr.msra.gmra.mxu1 %vm164_vm2, %v338_v28  ;;  %1910 = vmatprep.mubr.msk.f32.mxu0 %vm2099_vm1, %v2097_v0 }
 0x36c   :  { %1894 = vmatpush3.xpose.msk.msra.mxu1 %vm164_vm2, %v821_v24  ;;  %1895 = vmatprep.mubr.msk.f32.mxu1 %vm2099_vm1, %v2097_v0 }
 0x36d   :  { %1903 = vmatprep.subr.mxu1 %v2097_v0 }
 0x36f   :  { %1896 = vmatmul.mubr.msk.f32.vlgmr.msra.gmra.mxu1 %vm164_vm2, %v819_v29 }
 0x370   :  { %1905 = vmatprep.mubr.msk.f32.mxu1 %vm2099_vm1, %v2097_v0 }
 0x41f   :  { %v668_v30 = vpop.f32.mrf.mxu0 }
 0x421   :  { %v1882_v31 = vpop.f32.mrf.mxu0 }
 0x426   :  { %v814_v32 = vpop.f32.mrf.mxu0 }
 0x427   :  { %v2286_v33 = vadd.f32 %v814_v32, %v668_v30  ;;  %v591_v34 = vpop.f32.mrf.mxu1 }
 0x428   :  { %v1892_v35 = vpop.f32.mrf.mxu0 }
 0x429   :  { %v1877_v36 = vpop.f32.mrf.mxu1 }
 0x42a   :  { %v970_v37 = vpop.f32.mrf.mxu0 }
 0x42b   :  { %v741_v38 = vpop.f32.mrf.mxu1  ;;  %v977_v39 = vsel %vm164_vm2, %v970_v37, -inf }
 0x42c   :  { %v2289_v40 = vadd.f32 %v741_v38, %v591_v34  ;;  %978 = vmax.xlane.f32.xlu0 %v977_v39  ;;  %v1902_v41 = vpop.f32.mrf.mxu0 }
 0x42d   :  { %v1887_v42 = vpop.f32.mrf.mxu1 }
 0x42f   :  { %v892_v43 = vpop.f32.mrf.mxu1 }
 0x430   :  { %v974_v44 = vsel %vm164_vm2, %v892_v43, -inf }
 0x431   :  { %975 = vmax.xlane.f32.xlu1 %v974_v44  ;;  %v1897_v45 = vpop.f32.mrf.mxu1 }
 0x442   :  { %996 = vrot.lane.b32.xlu0 %v2198_v17, %s2105_s26  ;;  %1072 = vrot.lane.b32.xlu1 %v2200_v18, %s2105_s26 }
 0x446   :  { %1152 = vrot.lane.b32.xlu1 %v2203_v22, %s2106_s27 }
 0x4b5   :  { %v979_v46 = vpop.xlane.xlu0 %978 }
 0x4b6   :  { %v981_v47 = vsub.f32 %v970_v37, %v979_v46 }
 0x4b8   :  { %v984_v48 = vmul.f32 1.442695, %v981_v47 }
 0x4b9   :  { %v997_v49 = vpop.permute.xlu0 %996 }
 0x4ba   :  { %2003 = vpow2.f32 %v984_v48  ;;  %1904 = vmatpush3.msra.mxu1 %v997_v49  ;;  %v976_v50 = vpop.xlane.xlu1 %975 }
 0x4bb   :  { %v980_v51 = vsub.f32 %v892_v43, %v976_v50  ;;  %1913 = vmatprep.subr.mxu1 %v2097_v0 }
 0x4bd   :  { %v982_v52 = vmul.f32 1.442695, %v980_v51 }
 0x4be   :  { %v1073_v53 = vpop.permute.xlu1 %1072 }
 0x4bf   :  { %2005 = vpow2.f32 %v982_v52  ;;  %1909 = vmatpush3.msra.mxu0 %v1073_v53 }
 0x4c0   :  { %1918 = vmatprep.subr.mxu0 %v2097_v0 }
 0x4c2   :  { %v1153_v57 = vpop.permute.xlu1 %1152 }
 0x4c7   :  { %v2004_v54 = vpop.eup %2003 }
 0x4c8   :  { %v989_v55 = vsel %vm164_vm2, %v2004_v54, 0.0 }
 0x4c9   :  { %990 = vadd.xlane.f32.xlu1 %v989_v55 }
 0x4cc   :  { %v2006_v22 = vpop.eup %2005 }
 0x4cd   :  { %v986_v56 = vsel %vm164_vm2, %v2006_v22, 0.0 }
 0x4ce   :  { %987 = vadd.xlane.f32.xlu0 %v986_v56 }
 0x4da   :  { %1150 = vrot.lane.b32.xlu1 %v2214_v25, %s2107_s28 }
 0x4e4   :  { %1230 = vrot.lane.b32.xlu0 %v2205_v23, %s2106_s27 }
 0x4e8   :  { %1228 = vrot.lane.b32.xlu0 %v2216_v26, %s2107_s28 }
 0x552   :  { %v991_v58 = vpop.xlane.xlu1 %990 }
 0x553   :  { %2007 = vrcp.f32 %v991_v58 }
 0x556   :  { %v1151_v63 = vpop.permute.xlu1 %1150 }
 0x557   :  { %v988_v59 = vpop.xlane.xlu0 %987 }
 0x558   :  { %2009 = vrcp.f32 %v988_v59 }
 0x55b   :  { %v1231_v61 = vpop.permute.xlu0 %1230 }
 0x55f   :  { %v1229_v23 = vpop.permute.xlu0 %1228 }
 0x560   :  { %v2008_v60 = vpop.eup %2007 }
 0x561   :  { %v995_v62 = vmul.f32 %v2008_v60, %v2004_v54  ;;  %v1531_v60 = vld [vmem:[%s2400_s2 + $0x10] sm:$0xff] }
 0x563   :  { %1911 = vmatmul.mubr.msk.f32.vlgmr.msra.gmra.mxu0 %vm164_vm2, %v995_v62  ;;  %v1529_v62 = vld [vmem:[%s2400_s2] sm:$0xff] }
 0x564   :  { %1919 = vmatpush3.xpose.msk.msra.mxu0 %vm164_vm2, %v1231_v61  ;;  %1920 = vmatprep.mubr.msk.f32.mxu0 %vm2099_vm1, %v2097_v0  ;;  %v1530_v61 = vld [vmem:[%s2400_s2 + $0x8] sm:$0xff] }
 0x565   :  { %v2010_v25 = vpop.eup %2009  ;;  %1928 = vmatprep.subr.mxu0 %v2097_v0 }
 0x566   :  { %v994_v26 = vmul.f32 %v2010_v25, %v2006_v22  ;;  %v1627_v25 = vld [vmem:[%s2401_s3 + $0x38] sm:$0xff] }
 0x567   :  { %1921 = vmatmul.mubr.msk.f32.vlgmr.msra.gmra.mxu0 %vm164_vm2, %v1229_v23  ;;  %v1626_v23 = vld [vmem:[%s2401_s3 + $0x30] sm:$0xff] }
 0x568   :  { %1906 = vmatmul.mubr.msk.f32.vlgmr.msra.gmra.mxu1 %vm164_vm2, %v994_v26  ;;  %1930 = vmatprep.mubr.msk.f32.mxu0 %vm2099_vm1, %v2097_v0  ;;  %v1625_v26 = vld [vmem:[%s2401_s3 + $0x28] sm:$0xff] }
 0x569   :  { %1914 = vmatpush3.xpose.msk.msra.mxu1 %vm164_vm2, %v1153_v57  ;;  %1915 = vmatprep.mubr.msk.f32.mxu1 %vm2099_vm1, %v2097_v0 }
 0x56a   :  { %1923 = vmatprep.subr.mxu1 %v2097_v0 }
 0x56c   :  { %1916 = vmatmul.mubr.msk.f32.vlgmr.msra.gmra.mxu1 %vm164_vm2, %v1151_v63  ;;  %v1624_v63 = vld [vmem:[%s2401_s3 + $0x20] sm:$0xff] }
 0x56d   :  { %1925 = vmatprep.mubr.msk.f32.mxu1 %vm2099_vm1, %v2097_v0 }
 0x623   :  { %v1144_v1 = vpop.f32.mrf.mxu0 }
 0x624   :  { %v1149_v3 = vadd.f32 %v1144_v1, %v2286_v33 }
 0x625   :  { %v1912_v4 = vpop.f32.mrf.mxu0 }
 0x627   :  { %v1302_v5 = vpop.f32.mrf.mxu0 }
 0x628   :  { %v1068_v6 = vpop.f32.mrf.mxu1  ;;  %v1309_v7 = vsel %vm164_vm2, %v1302_v5, -inf }
 0x629   :  { %v1148_v8 = vadd.f32 %v1068_v6, %v2289_v40  ;;  %1310 = vmax.xlane.f32.xlu0 %v1309_v7  ;;  %v1922_v9 = vpop.f32.mrf.mxu0 }
 0x62a   :  { %v1907_v11 = vpop.f32.mrf.mxu1 }
 0x62c   :  { %v1224_v12 = vpop.f32.mrf.mxu1 }
 0x62d   :  { %v1306_v15 = vsel %vm164_vm2, %v1224_v12, -inf }
 0x62e   :  { %1307 = vmax.xlane.f32.xlu1 %v1306_v15  ;;  %v1917_v16 = vpop.f32.mrf.mxu1  ;;  %v1525_v15 = vsub.s32 4, %v2153_v2 }
 0x6b2   :  { %v1311_v19 = vpop.xlane.xlu0 %1310 }
 0x6b3   :  { %v1313_v0 = vsub.f32 %v1302_v5, %v1311_v19 }
 0x6b5   :  { %v1316_v20 = vmul.f32 1.442695, %v1313_v0 }
 0x6b7   :  { %2011 = vpow2.f32 %v1316_v20  ;;  %v1308_v21 = vpop.xlane.xlu1 %1307  ;;  %v1526_v20 = vrot.slane %v2174_v10, %v1525_v15 }
 0x6b8   :  { %v1312_v24 = vsub.f32 %v1224_v12, %v1308_v21 }
 0x6ba   :  { %v1314_v27 = vmul.f32 1.442695, %v1312_v24 }
 0x6bc   :  { %2013 = vpow2.f32 %v1314_v27 }
 0x6c4   :  { %v2012_v28 = vpop.eup %2011 }
 0x6c5   :  { %v1321_v29 = vsel %vm164_vm2, %v2012_v28, 0.0 }
 0x6c6   :  { %1322 = vadd.xlane.f32.xlu1 %v1321_v29  ;;  %v1622_v29 = vld [vmem:[%s2401_s3 + $0x10] sm:$0xff] }
 0x6c9   :  { %v2014_v30 = vpop.eup %2013 }
 0x6ca   :  { %v1318_v31 = vsel %vm164_vm2, %v2014_v30, 0.0 }
 0x6cb   :  { %1319 = vadd.xlane.f32.xlu0 %v1318_v31  ;;  %v1620_v31 = vld [vmem:[%s2401_s3] sm:$0xff] }
 0x6d7   :  { %1404 = vrot.lane.b32.xlu1 %v2200_v18, %s2098_s1  ;;  %v1484_v18 = vsub.s32 2, %v2153_v2 }
 0x6e1   :  { %1328 = vrot.lane.b32.xlu0 %v2198_v17, %s2098_s1  ;;  %v1485_v17 = vrot.slane %v2174_v10, %v1484_v18  ;;  %v1630_v18 = vsub.s32 6, %v2153_v2 }
 0x74f   :  { %v1323_v32 = vpop.xlane.xlu1 %1322 }
 0x750   :  { %2015 = vrcp.f32 %v1323_v32  ;;  %v1535_v32 = vsub.s32 5, %v2153_v2 }
 0x753   :  { %v1405_v33 = vpop.permute.xlu1 %1404 }
 0x754   :  { %v1320_v34 = vpop.xlane.xlu0 %1319  ;;  %1929 = vmatpush3.msra.mxu0 %v1405_v33  ;;  %v1536_v33 = vrot.slane %v2174_v10, %v1535_v32 }
 0x755   :  { %2017 = vrcp.f32 %v1320_v34  ;;  %1944 = vmatprep.subr.mxu0 %v1627_v25 }
 0x758   :  { %v1329_v35 = vpop.permute.xlu0 %1328 }
 0x759   :  { %1924 = vmatpush3.msra.mxu1 %v1329_v35 }
 0x75d   :  { %v2016_v36 = vpop.eup %2015 }
 0x75e   :  { %v1327_v37 = vmul.f32 %v2016_v36, %v2012_v28  ;;  %v1623_v28 = vld [vmem:[%s2401_s3 + $0x18] sm:$0xff] }
 0x760   :  { %1931 = vmatmul.mubr.msk.f32.vlgmr.msra.gmra.mxu0 %vm164_vm2, %v1327_v37 }
 0x761   :  { %1945 = vmatpush3.msra.mxu0 %v1627_v25 }
 0x762   :  { %v2018_v38 = vpop.eup %2017  ;;  %1946 = vmatprep.subr.mxu0 %v1626_v23 }
 0x763   :  { %v1326_v39 = vmul.f32 %v2018_v38, %v2014_v30  ;;  %1947 = vmatpush3.msra.mxu0 %v1626_v23  ;;  %v1621_v30 = vld [vmem:[%s2401_s3 + $0x8] sm:$0xff]  ;;  %s2108_s3 = smov [#allocation7]  }
 0x764   :  { %1948 = vmatprep.subr.mxu0 %v1625_v26  ;;  %s1761_s26 = sshll.u32 %s2108_s3, 4  ;;  %s1762_s26 = int_to_ptr.vmem [resolvable:$true] %s1761_s26 }
 0x765   :  { %1926 = vmatmul.mubr.msk.f32.vlgmr.msra.gmra.mxu1 %vm164_vm2, %v1326_v39  ;;  %1949 = vmatpush3.msra.mxu0 %v1625_v26  ;;  %s2067_s27 = scalar_lea.vmem %s1762_s26, 256  ;;  %p2072_p11 = scmp.lt.s32.totalorder %s1762_s26, %s1762_s26 }
 0x766   :  { %1950 = vmatprep.subr.mxu0 %v1624_v63  ;;  %p2068_p10 = scmp.ne.s32.totalorder %s1762_s26, %s2067_s27  ;;  %p2073_p12 = scmp.lt.s32.totalorder %s2067_s27, %s2067_s27 }
 0x767   :  { %1951 = vmatpush3.msra.mxu0 %v1624_v63  ;;  %v1804_v63 = vld [vmem:[#allocation5 + $0x8] ss:$0 sm:$0xff] }
 0x768   :  { %1952 = vmatprep.subr.mxu0 %v1623_v28  ;;  %p2074_p13 = por %p2073_p12, %p2072_p11 }
 0x769   :  { %1953 = vmatpush3.msra.mxu0 %v1623_v28 }
 0x76a   :  { %1954 = vmatprep.subr.mxu0 %v1622_v29  ;;  %p2075_p0 = pnand %p2074_p13, %p2068_p10 }
 0x76b   :  { %1955 = vmatpush3.msra.mxu0 %v1622_v29 }
 0x76c   :  { %1956 = vmatprep.subr.mxu0 %v1621_v30 }
 0x76d   :  { %1957 = vmatpush3.msra.mxu0 %v1621_v30 }
 0x76e   :  { %1958 = vmatprep.subr.mxu0 %v1620_v31 }
 0x76f   :  { %1959 = vmatpush3.msra.mxu0 %v1620_v31 }
 0x820   :  { %v1476_v40 = vpop.f32.mrf.mxu0 }
 0x821   :  { %v1481_v41 = vadd.f32 %v1476_v40, %v1149_v3 }
 0x822   :  { %v1932_v42 = vpop.f32.mrf.mxu0 }
 0x823   :  { %v1487_v43 = vadd.f32 %v1485_v17, %v1481_v41 }
 0x825   :  { %v1400_v44 = vpop.f32.mrf.mxu1  ;;  %v1489_v45 = vadd.f32 %v1487_v43, %v2184_v14 }
 0x826   :  { %v1480_v46 = vadd.f32 %v1400_v44, %v1148_v8  ;;  %v1519_v8 = vsub.s32 3, %v2153_v2 }
 0x827   :  { %v1927_v47 = vpop.f32.mrf.mxu1  ;;  %v1493_v48 = vsel %vm61_vm0, %v1489_v45, 0.0 }
 0x828   :  { %v1486_v49 = vadd.f32 %v1485_v17, %v1480_v46  ;;  %1494 = vadd.xlane.f32.xlu0 %v1493_v48  ;;  %v1520_v12 = vrot.slane %v2174_v10, %v1519_v8  ;;  %v1631_v17 = vrot.slane %v2174_v10, %v1630_v18 }
 0x82a   :  { %v1488_v50 = vadd.f32 %v1486_v49, %v2182_v13  ;;  %v1532_v13 = vld [vmem:[%s2400_s2 + $0x18] sm:$0xff] }
 0x82b   :  { %1933 = vmatprep.subr.mxu1 %v1532_v13 }
 0x82c   :  { %v1490_v51 = vsel %vm61_vm0, %v1488_v50, 0.0  ;;  %1934 = vmatpush3.msra.mxu1 %v1532_v13 }
 0x82d   :  { %1491 = vadd.xlane.f32.xlu1 %v1490_v51  ;;  %1935 = vmatprep.subr.mxu1 %v1531_v60 }
 0x82e   :  { %1936 = vmatpush3.msra.mxu1 %v1531_v60 }
 0x82f   :  { %1937 = vmatprep.subr.mxu1 %v1530_v61 }
 0x830   :  { %1938 = vmatpush3.msra.mxu1 %v1530_v61  ;;  %v1744_v61 = vsub.s32 7, %v2153_v2 }
 0x831   :  { %1939 = vmatprep.subr.mxu1 %v1529_v62 }
 0x832   :  { %1940 = vmatpush3.msra.mxu1 %v1529_v62  ;;  %v1745_v62 = vrot.slane %v2174_v10, %v1744_v61 }
 0x8b1   :  { %v1495_v52 = vpop.xlane.xlu0 %1494 }
 0x8b2   :  { %v1498_v53 = vmul.f32 0.03125, %v1495_v52 }
 0x8b4   :  { %v1500_v54 = vsub.f32 %v1489_v45, %v1498_v53 }
 0x8b6   :  { %v1492_v55 = vpop.xlane.xlu1 %1491  ;;  %v1502_v22 = vmul.f32 %v1500_v54, %v1500_v54 }
 0x8b7   :  { %v1497_v56 = vmul.f32 0.03125, %v1492_v55 }
 0x8b8   :  { %v1506_v57 = vsel %vm61_vm0, %v1502_v22, 0.0 }
 0x8b9   :  { %v1499_v14 = vsub.f32 %v1488_v50, %v1497_v56  ;;  %1507 = vadd.xlane.f32.xlu1 %v1506_v57 }
 0x8bb   :  { %v1501_v58 = vmul.f32 %v1499_v14, %v1499_v14 }
 0x8bd   :  { %v1503_v59 = vsel %vm61_vm0, %v1501_v58, 0.0 }
 0x8be   :  { %1504 = vadd.xlane.f32.xlu0 %v1503_v59 }
 0x942   :  { %v1508_v1 = vpop.xlane.xlu1 %1507 }
 0x943   :  { %v1510_v3 = vmul.f32 0.03125, %v1508_v1 }
 0x945   :  { %v1512_v4 = vadd.f32 1e-05, %v1510_v3 }
 0x947   :  { %2019 = vrsqrt.f32 %v1512_v4  ;;  %v1505_v5 = vpop.xlane.xlu0 %1504 }
 0x948   :  { %v1509_v6 = vmul.f32 0.03125, %v1505_v5 }
 0x94a   :  { %v1511_v7 = vadd.f32 1e-05, %v1509_v6 }
 0x94c   :  { %2021 = vrsqrt.f32 %v1511_v7 }
 0x954   :  { %v2020_v9 = vpop.eup %2019 }
 0x955   :  { %v1516_v11 = vmul.f32 %v2020_v9, %v1500_v54 }
 0x957   :  { %v1522_v0 = vmul.f32 %v1520_v12, %v1516_v11 }
 0x959   :  { %v2022_v16 = vpop.eup %2021  ;;  %v1528_v27 = vadd.f32 %v1526_v20, %v1522_v0 }
 0x95a   :  { %v1515_v19 = vmul.f32 %v2022_v16, %v1499_v14 }
 0x95c   :  { %v1521_v21 = vmul.f32 %v1520_v12, %v1515_v19 }
 0x95e   :  { %v1527_v24 = vadd.f32 %v1526_v20, %v1521_v21 }
 0x960   :  { %1941 = vmatprep.mubr.msk.f32.mxu1 %vm61_vm0, %v1527_v24 }
 0x961   :  { %1942 = vmatmul.mubr.msk.f32.vlgmr.msra.gmra.mxu1 %vm61_vm0, %v1528_v27 }
 0xa21   :  { %v1943_v34 = vpop.f32.mrf.mxu1 }
 0xa22   :  { %v1615_v35 = vadd.f32 %v1943_v34, %v1536_v33 }
 0xa23   :  { %v1609_v36 = vpop.f32.mrf.mxu1 }
 0xa24   :  { %v1610_v37 = vadd.f32 %v1609_v36, %v1536_v33  ;;  %v1619_v39 = vmax.f32 %v1615_v35, 0.0 }
 0xa26   :  { %v1618_v38 = vmax.f32 %v1610_v37, 0.0 }
 0xa28   :  { %1960 = vmatprep.mubr.msk.f32.mxu0 %vm1632_vm3, %v1618_v38 }
 0xa29   :  { %1961 = vmatmul.mubr.msk.f32.vlgmr.msra.gmra.mxu0 %vm1632_vm3, %v1619_v39 }
 0xae9   :  { %v1962_v40 = vpop.f32.mrf.mxu0 }
 0xaea   :  { %v1711_v41 = vadd.f32 %v1962_v40, %v1631_v17 }
 0xaeb   :  { %v1705_v42 = vpop.f32.mrf.mxu0 }
 0xaec   :  { %v1706_v43 = vadd.f32 %v1705_v42, %v1631_v17  ;;  %v1715_v44 = vadd.f32 %v1711_v41, %v1528_v27 }
 0xaee   :  { %v1719_v45 = vsel %vm61_vm0, %v1715_v44, 0.0  ;;  %v1714_v46 = vadd.f32 %v1706_v43, %v1527_v24 }
 0xaef   :  { %1720 = vadd.xlane.f32.xlu1 %v1719_v45 }
 0xaf0   :  { %v1716_v47 = vsel %vm61_vm0, %v1714_v46, 0.0 }
 0xaf1   :  { %1717 = vadd.xlane.f32.xlu0 %v1716_v47 }
 0xb78   :  { %v1721_v48 = vpop.xlane.xlu1 %1720 }
 0xb79   :  { %v1723_v49 = vmul.f32 0.03125, %v1721_v48 }
 0xb7a   :  { %v1718_v50 = vpop.xlane.xlu0 %1717 }
 0xb7b   :  { %v1725_v51 = vsub.f32 %v1715_v44, %v1723_v49  ;;  %v1722_v52 = vmul.f32 0.03125, %v1718_v50 }
 0xb7d   :  { %v1724_v53 = vsub.f32 %v1714_v46, %v1722_v52  ;;  %v1727_v54 = vmul.f32 %v1725_v51, %v1725_v51 }
 0xb7f   :  { %v1731_v55 = vsel %vm61_vm0, %v1727_v54, 0.0  ;;  %v1726_v22 = vmul.f32 %v1724_v53, %v1724_v53 }
 0xb80   :  { %1732 = vadd.xlane.f32.xlu1 %v1731_v55 }
 0xb81   :  { %v1728_v56 = vsel %vm61_vm0, %v1726_v22, 0.0 }
 0xb82   :  { %1729 = vadd.xlane.f32.xlu0 %v1728_v56 }
 0xc09   :  { %v1733_v57 = vpop.xlane.xlu1 %1732 }
 0xc0a   :  { %v1735_v14 = vmul.f32 0.03125, %v1733_v57 }
 0xc0b   :  { %v1730_v58 = vpop.xlane.xlu0 %1729 }
 0xc0c   :  { %v1737_v59 = vadd.f32 1e-05, %v1735_v14  ;;  %v1734_v13 = vmul.f32 0.03125, %v1730_v58 }
 0xc0e   :  { %2023 = vrsqrt.f32 %v1737_v59  ;;  %v1736_v60 = vadd.f32 1e-05, %v1734_v13 }
 0xc10   :  { %2025 = vrsqrt.f32 %v1736_v60 }
 0xc1b   :  { %v2024_v25 = vpop.eup %2023 }
 0xc1c   :  { %v1741_v23 = vmul.f32 %v2024_v25, %v1725_v51 }
 0xc1d   :  { %v2026_v26 = vpop.eup %2025 }
 0xc1e   :  { %v1740_v1 = vmul.f32 %v2026_v26, %v1724_v53  ;;  %v1747_v3 = vmul.f32 %v1745_v62, %v1741_v23 }
 0xc20   :  { %v1746_v4 = vmul.f32 %v1745_v62, %v1740_v1  ;;  %v1753_v5 = vadd.f32 %v1804_v63, %v1747_v3 }
 0xc22   :  { %v1752_v6 = vadd.f32 %v1804_v63, %v1746_v4  ;;  %1755 = vst.msk [vmem:[#allocation7 + $0x8] sm:$0xff] %vm61_vm0, %v1753_v5 }
 0xc24   :  { %1754 = vst.msk [vmem:[#allocation7] sm:$0xff] %vm61_vm0, %v1752_v6 }
 0xc25   :  { %2078 = shalt.err (!%p2075_p0)
}
 0xc26   :  { %1767 = dma.vmem_to_hbm [thread:$0]  %s1762_s26, 256, %s2403_s5, [#allocation4], %s2094_s21, %s2094_s21, %s2095_s22  }
 0xc27   :  { %2091 = dma.done.wait [#allocation4], 256  }
 0xc28   :  { %2092 = vsyncadd [#allocation4], 4294967040 }
 0xc29   :  { %1771 = vsyncpa [#allocation3], 1 }
 0xc2a   :  { %1772 = vsyncpa [#allocation6], 1 }
 0xc2b   :  { %1773 = vsyncpa [#allocation4], 1 }

</bundles_post_ra>
